<compile_context>
chip_gen: v6e
topology: v6e:2x2x1
jax: 0.10.0
libtpu: 0.0.40
codegen_flags: <defaults>
</compile_context>

<pallas_src>
import numpy as np
import jax
import jax.numpy as jnp
from jax.experimental import pallas as pl
from jax.experimental.pallas import tpu as pltpu

# ----------------------------- dimensions -----------------------------------
T = 8                       # seq_len
C = 4                       # feature_dim
HID = 32                    # hidden_dim
TC = T * C                  # 32 = columns per half (dyn / mask)
IN_DIM = 2 * TC             # 64 = seq_len * (feature_dim * 2)  (original input_dim)

# Packed parameter slab layout (rows; every slice start is 8-sublane aligned).
W1A_ROW = 0                 # rows [  0,  32): W1 rows that multiply dyn features
W1B_ROW = TC                # rows [ 32,  64): W1 rows that multiply the mask
W2_ROW = 2 * TC             # rows [ 64,  96): W2
B1_ROW = W2_ROW + HID       # row   96       : b1
B2_ROW = B1_ROW + 8         # row  104       : b2
W_ROWS = B2_ROW + 8         # 112 rows total (zero padded)

_HI = jax.lax.Precision.HIGHEST


# ------------------------------- kernel --------------------------------------
def dynamic_model_kernel(xd_ref, xm_ref, w_ref, out_ref):
    """xd:[Bblk,TC] xm:[Bblk,TC] w:[W_ROWS,HID] packed slab -> out:[Bblk,HID]."""
    f32 = jnp.float32

    xd = xd_ref[...]
    xm = xm_ref[...]
    w1a = w_ref[W1A_ROW:W1A_ROW + TC, :]        # [TC,  HID]
    w1b = w_ref[W1B_ROW:W1B_ROW + TC, :]        # [TC,  HID]
    w2 = w_ref[W2_ROW:W2_ROW + HID, :]          # [HID, HID]
    b1 = w_ref[B1_ROW:B1_ROW + 1, :]            # [1,   HID] (broadcast over batch)
    b2 = w_ref[B2_ROW:B2_ROW + 1, :]            # [1,   HID]

    # layer 1: (cat+flatten folded in) Linear + ReLU
    h = jnp.dot(xd, w1a, preferred_element_type=f32, precision=_HI)
    h = h + jnp.dot(xm, w1b, preferred_element_type=f32, precision=_HI)
    h = jnp.maximum(h + b1, 0.0)

    # layer 2: Linear + ReLU
    y = jnp.dot(h, w2, preferred_element_type=f32, precision=_HI)
    y = jnp.maximum(y + b2, 0.0)

    out_ref[...] = y.astype(out_ref.dtype)


# ------------------------------ wrappers --------------------------------------
def _flatten_inputs(dynamic_features, missingness_mask):
    b = dynamic_features.shape[0]
    xd = dynamic_features.astype(jnp.float32).reshape(b, TC)   # contiguous, free
    xm = missingness_mask.astype(jnp.float32).reshape(b, TC)
    return xd, xm


def dynamic_model_forward(dynamic_features, missingness_mask, w_slab):
    """One-shot (small batch) call: gridless, whole-array VMEM residency."""
    xd, xm = _flatten_inputs(dynamic_features, missingness_mask)
    b = xd.shape[0]
    return pl.pallas_call(
        dynamic_model_kernel,
        out_shape=jax.ShapeDtypeStruct((b, HID), jnp.float32),
        in_specs=[
            pl.BlockSpec(memory_space=pltpu.MemorySpace.VMEM),  # dyn slab
            pl.BlockSpec(memory_space=pltpu.MemorySpace.VMEM),  # mask slab
            pl.BlockSpec(memory_space=pltpu.MemorySpace.VMEM),  # packed params
        ],
        out_specs=pl.BlockSpec(memory_space=pltpu.MemorySpace.VMEM),
    )(xd, xm, w_slab)


def dynamic_model_forward_batched(dynamic_features, missingness_mask, w_slab,
                                  block_b=128):
    """Many stacked invocations under one grid.

    Weight slab has a constant index_map -> DMA'd once, VMEM-resident across
    every grid step; the batch axis is 'parallel' so v7x shards it across its
    two TensorCores.
    """
    xd, xm = _flatten_inputs(dynamic_features, missingness_mask)
    b = xd.shape[0]
    assert b % block_b == 0, "pad batch to a multiple of block_b"
    grid = (b // block_b,)
    return pl.pallas_call(
        dynamic_model_kernel,
        out_shape=jax.ShapeDtypeStruct((b, HID), jnp.float32),
        grid=grid,
        in_specs=[
            pl.BlockSpec((block_b, TC), lambda i: (i, 0)),
            pl.BlockSpec((block_b, TC), lambda i: (i, 0)),
            pl.BlockSpec((W_ROWS, HID), lambda i: (0, 0)),   # resident weights
        ],
        out_specs=pl.BlockSpec((block_b, HID), lambda i: (i, 0)),
        compiler_params=pltpu.CompilerParams(
            dimension_semantics=("parallel",)),
    )(xd, xm, w_slab)


# ------------------------------ params ----------------------------------------
def init_params(key):
    """PyTorch nn.Linear default init; returns (packed slab, raw params)."""
    def dense(key, fan_in, fan_out):
        kw, kb = jax.random.split(key)
        scale = 1.0 / np.sqrt(float(fan_in))
        w = jax.random.uniform(kw, (fan_in, fan_out), jnp.float32, -scale, scale)
        b = jax.random.uniform(kb, (fan_out,), jnp.float32, -scale, scale)
        return w, b

    k1, k2 = jax.random.split(key)
    w1, b1 = dense(k1, IN_DIM, HID)     # Linear(input_dim -> hidden_dim), [in,out]
    w2, b2 = dense(k2, HID, HID)        # Linear(hidden_dim -> hidden_dim)

    # Pre-permute W1's rows to match the split (dyn | mask) input layout:
    # original flattened column t*2C + c      -> dyn feature (t, c)
    # original flattened column t*2C + C + c  -> mask value  (t, c)
    idx = np.arange(IN_DIM)
    dyn_rows = idx[(idx % (2 * C)) < C]       # -> position t*C + c in W1a
    mask_rows = idx[(idx % (2 * C)) >= C]     # -> position t*C + c in W1b
    w1a = w1[dyn_rows, :]                      # [TC, HID]
    w1b = w1[mask_rows, :]                     # [TC, HID]

    w_slab = jnp.zeros((W_ROWS, HID), jnp.float32)
    w_slab = w_slab.at[W1A_ROW:W1A_ROW + TC, :].set(w1a)
    w_slab = w_slab.at[W1B_ROW:W1B_ROW + TC, :].set(w1b)
    w_slab = w_slab.at[W2_ROW:W2_ROW + HID, :].set(w2)
    w_slab = w_slab.at[B1_ROW, :].set(b1)
    w_slab = w_slab.at[B2_ROW, :].set(b2)

    raw = (w1, b1, w2, b2)
    return w_slab, raw


def reference_forward(dynamic_features, missingness_mask, raw):
    """Pure-JAX reference that mirrors the PyTorch module exactly."""
    w1, b1, w2, b2 = raw
    x = jnp.concatenate(
        [dynamic_features.astype(jnp.float32),
         missingness_mask.astype(jnp.float32)], axis=-1)       # [B, T, 2C]
    x = x.reshape(x.shape[0], -1)                              # [B, T*2C]
    h = jax.nn.relu(x @ w1 + b1)
    return jax.nn.relu(h @ w2 + b2)


# -------------------------------- demo -----------------------------------------
if __name__ == "__main__":
    key = jax.random.PRNGKey(0)
    k_dyn, k_msk, k_par, k_dyn2, k_msk2 = jax.random.split(key, 5)

    w_slab, raw = init_params(k_par)

    # --- single small forward (gridless path) --------------------------------
    B_SMALL = 8
    dyn = jax.random.normal(k_dyn, (B_SMALL, T, C), jnp.float32)
    msk = (jax.random.uniform(k_msk, (B_SMALL, T, C)) > 0.2).astype(jnp.float32)

    out = dynamic_model_forward(dyn, msk, w_slab)
    out = jax.block_until_ready(out)
    ref = reference_forward(dyn, msk, raw)
    assert out.shape == (B_SMALL, HID)
    assert jnp.allclose(out, ref, atol=1e-4, rtol=1e-4)

    # --- stacked invocations amortized under one grid (batched path) ---------
    B_BIG, BLOCK_B = 512, 128
    dyn_b = jax.random.normal(k_dyn2, (B_BIG, T, C), jnp.float32)
    msk_b = (jax.random.uniform(k_msk2, (B_BIG, T, C)) > 0.2).astype(jnp.float32)

    out_b = dynamic_model_forward_batched(dyn_b, msk_b, w_slab, block_b=BLOCK_B)
    out_b = jax.block_until_ready(out_b)
    ref_b = reference_forward(dyn_b, msk_b, raw)
    assert out_b.shape == (B_BIG, HID)
    assert jnp.allclose(out_b, ref_b, atol=1e-4, rtol=1e-4)

    print("KERNEL_OK")
</pallas_src>

<mosaic_0001>
module attributes {stable_mosaic.version = 11 : i64} {
  func.func @dynamic_model_kernel(%arg0: memref<8x32xf32, #tpu.memory_space<vmem>>, %arg1: memref<8x32xf32, #tpu.memory_space<vmem>>, %arg2: memref<112x32xf32, #tpu.memory_space<vmem>>, %arg3: memref<8x32xf32, #tpu.memory_space<vmem>>) attributes {dimension_semantics = [], scalar_prefetch = 0 : i64, scratch_operands = 0 : i64, tpu.core_type = #tpu.core_type<tc>} {
    %c0 = arith.constant 0 : index
    %c0_0 = arith.constant 0 : index
    %0 = vector.load %arg0[%c0, %c0_0] : memref<8x32xf32, #tpu.memory_space<vmem>>, vector<8x32xf32>
    %c0_1 = arith.constant 0 : index
    %c0_2 = arith.constant 0 : index
    %1 = vector.load %arg1[%c0_1, %c0_2] : memref<8x32xf32, #tpu.memory_space<vmem>>, vector<8x32xf32>
    %c0_3 = arith.constant 0 : index
    %c0_4 = arith.constant 0 : index
    %2 = vector.load %arg2[%c0_3, %c0_4] : memref<112x32xf32, #tpu.memory_space<vmem>>, vector<32x32xf32>
    %c32 = arith.constant 32 : index
    %c0_5 = arith.constant 0 : index
    %3 = vector.load %arg2[%c32, %c0_5] : memref<112x32xf32, #tpu.memory_space<vmem>>, vector<32x32xf32>
    %c64 = arith.constant 64 : index
    %c0_6 = arith.constant 0 : index
    %4 = vector.load %arg2[%c64, %c0_6] : memref<112x32xf32, #tpu.memory_space<vmem>>, vector<32x32xf32>
    %c96 = arith.constant 96 : index
    %c0_7 = arith.constant 0 : index
    %5 = vector.load %arg2[%c96, %c0_7] : memref<112x32xf32, #tpu.memory_space<vmem>>, vector<1x32xf32>
    %c104 = arith.constant 104 : index
    %c0_8 = arith.constant 0 : index
    %6 = vector.load %arg2[%c104, %c0_8] : memref<112x32xf32, #tpu.memory_space<vmem>>, vector<1x32xf32>
    %cst = arith.constant dense<0.000000e+00> : vector<8x32xf32>
    %7 = tpu.matmul %0, %2, %cst {dimension_numbers = #tpu.dot_dimension_numbers<[1], [0], [0], [1], [0, 0, 1, 1], [], []>, precision = #tpu.contract_precision<fp32>} : vector<8x32xf32>, vector<32x32xf32>, vector<8x32xf32> -> vector<8x32xf32>
    %cst_9 = arith.constant dense<0.000000e+00> : vector<8x32xf32>
    %8 = tpu.matmul %1, %3, %cst_9 {dimension_numbers = #tpu.dot_dimension_numbers<[1], [0], [0], [1], [0, 0, 1, 1], [], []>, precision = #tpu.contract_precision<fp32>} : vector<8x32xf32>, vector<32x32xf32>, vector<8x32xf32> -> vector<8x32xf32>
    %9 = arith.addf %7, %8 : vector<8x32xf32>
    %10 = vector.broadcast %5 : vector<1x32xf32> to vector<8x32xf32>
    %11 = arith.addf %9, %10 : vector<8x32xf32>
    %cst_10 = arith.constant 0.000000e+00 : f32
    %12 = vector.broadcast %cst_10 : f32 to vector<8x32xf32>
    %13 = arith.maximumf %11, %12 : vector<8x32xf32>
    %cst_11 = arith.constant dense<0.000000e+00> : vector<8x32xf32>
    %14 = tpu.matmul %13, %4, %cst_11 {dimension_numbers = #tpu.dot_dimension_numbers<[1], [0], [0], [1], [0, 0, 1, 1], [], []>, precision = #tpu.contract_precision<fp32>} : vector<8x32xf32>, vector<32x32xf32>, vector<8x32xf32> -> vector<8x32xf32>
    %15 = vector.broadcast %6 : vector<1x32xf32> to vector<8x32xf32>
    %16 = arith.addf %14, %15 : vector<8x32xf32>
    %cst_12 = arith.constant 0.000000e+00 : f32
    %17 = vector.broadcast %cst_12 : f32 to vector<8x32xf32>
    %18 = arith.maximumf %16, %17 : vector<8x32xf32>
    %c0_13 = arith.constant 0 : index
    %c0_14 = arith.constant 0 : index
    %19 = vector.load %arg3[%c0_13, %c0_14] : memref<8x32xf32, #tpu.memory_space<vmem>>, vector<8x32xf32>
    tpu.vector_store %arg3[%c0_13, %c0_14], %18 {strides = array<i32>} : memref<8x32xf32, #tpu.memory_space<vmem>>, vector<8x32xf32>,
    return
  }
}

</mosaic_0001>

<bundles_post_ra>
// kernel: tpu_custom_call.1
= control target key start
LH: loop header
LB: loop body
LE: loop exit
PB: predicated region body
PF: predicated region fallthrough
CT: control target
= control target key end

     0   :  { %vm31_vm0 = vcmask 261120   ;;  %v1837_v3 = vmov 0.0   ;;  %vm1838_vm1 = vmmov 0   ;;  %s2200_s0 = inlined_call_operand.vmem [shape: f32[8,32], index: 0, kind: input, shape index: {}]   ;;  %s2201_s1 = inlined_call_operand.vmem [shape: f32[8,32], index: 1, kind: input, shape index: {}]   ;;  %s2202_s2 = inlined_call_operand.vmem [shape: f32[112,32], index: 2, kind: input, shape index: {}]   ;;  %s2203_s3 = inlined_call_operand.hbm [shape: f32[8,32], index: 3, kind: output, shape index: {}]  }
   0x1   :  { %v24_v0 = vld [vmem:[%s2202_s2 + $0x38] sm:$0xff]  ;;  %v23_v1 = vld [vmem:[%s2202_s2 + $0x30] sm:$0xff]  ;;  %v22_v2 = vld [vmem:[%s2202_s2 + $0x28] sm:$0xff]  ;;  %1614 = vmatprep.subr.mxu0 %v1837_v3  ;;  %1625 = vmatprep.subr.mxu1 %v1837_v3 }
   0x2   :  { %v1870_v4 = vand.u32 4294901760, %v24_v0  ;;  %v1872_v5 = vand.u32 4294901760, %v23_v1  ;;  %v1874_v6 = vand.u32 4294901760, %v22_v2  ;;  %v21_v7 = vld [vmem:[%s2202_s2 + $0x20] sm:$0xff]  ;;  %1622 = vmatprep.mubr.msk.f32.mxu0 %vm1838_vm1, %v1837_v3  ;;  %1633 = vmatprep.mubr.msk.f32.mxu1 %vm1838_vm1, %v1837_v3 }
   0x3   :  { %v16_v8 = vld [vmem:[%s2201_s1] sm:$0xff]  ;;  %v1883_v9 = vand.u32 4294901760, %v21_v7 }
   0x4   :  { %v33_v10 = vsel %vm31_vm0, %v16_v8, 0  ;;  %1615 = vmatpush3.msra.mxu0 %v1870_v4  ;;  %v140_v11 = vsub.f32 %v24_v0, %v1870_v4  ;;  %v1895_v13 = vsub.f32 %v23_v1, %v1872_v5  ;;  %v1898_v14 = vsub.f32 %v22_v2, %v1874_v6 }
   0x5   :  { %v1892_v12 = vand.u32 4294901760, %v33_v10 }
   0x6   :  { %8 = vsyncpa [#allocation3], 0  ;;  %1616 = vmatprep.subr.mxu0 %v1837_v3  ;;  %v1902_v15 = vsub.f32 %v21_v7, %v1883_v9  ;;  %v141_v16 = vand.u32 4294901760, %v140_v11  ;;  %v148_v18 = vand.u32 4294901760, %v1895_v13  ;;  %v155_v19 = vand.u32 4294901760, %v1898_v14  ;;  %v15_v32 = vld [vmem:[%s2200_s0] sm:$0xff] }
   0x7   :  { %1617 = vmatpush3.msra.mxu0 %v1872_v5  ;;  %v1906_v17 = vsub.f32 %v33_v10, %v1892_v12  ;;  %v20_v33 = vld [vmem:[%s2202_s2 + $0x18] sm:$0xff]  ;;  %v521_v34 = vsel %vm31_vm0, %v15_v32, 0  ;;  %v19_v35 = vld [vmem:[%s2202_s2 + $0x10] sm:$0xff]  ;;  %v18_v38 = vld [vmem:[%s2202_s2 + $0x8] sm:$0xff]  ;;  %s1839_s15 = smov [#allocation2]  }
   0x8   :  { %1618 = vmatprep.subr.mxu0 %v1837_v3  ;;  %v162_v20 = vand.u32 4294901760, %v1902_v15  ;;  %v142_v21 = vsub.f32 %v140_v11, %v141_v16  ;;  %v149_v23 = vsub.f32 %v1895_v13, %v148_v18  ;;  %v156_v24 = vsub.f32 %v1898_v14, %v155_v19  ;;  %v17_v40 = vld [vmem:[%s2202_s2] sm:$0xff]  ;;  %v28_v63 = vld [vmem:[%s2202_s2 + $0x58] sm:$0xff]  ;;  %v27_v1 = vld [vmem:[%s2202_s2 + $0x50] sm:$0xff]  ;;  %s1514_s16 = sshll.u32 %s1839_s15, 4  ;;  %s1515_s16 = int_to_ptr.vmem [resolvable:$true] %s1514_s16 }
   0x9   :  { %1619 = vmatpush3.msra.mxu0 %v1874_v6  ;;  %v106_v22 = vand.u32 4294901760, %v1906_v17  ;;  %v1950_v36 = vand.u32 4294901760, %v20_v33  ;;  %v1952_v37 = vand.u32 4294901760, %v521_v34  ;;  %v1960_v39 = vand.u32 4294901760, %v19_v35  ;;  %s1815_s17 = scalar_lea.vmem %s1515_s16, 128  ;;  %p1820_p1 = scmp.lt.s32.totalorder %s1515_s16, %s1515_s16 }
   0xa   :  { %1620 = vmatprep.subr.mxu0 %v1837_v3  ;;  %v143_v25 = vand.u32 4294901760, %v142_v21  ;;  %v150_v27 = vand.u32 4294901760, %v149_v23  ;;  %v163_v28 = vsub.f32 %v1902_v15, %v162_v20  ;;  %v157_v30 = vand.u32 4294901760, %v156_v24  ;;  %p1816_p0 = scmp.ne.s32.totalorder %s1515_s16, %s1815_s17  ;;  %p1821_p2 = scmp.lt.s32.totalorder %s1815_s17, %s1815_s17 }
   0xb   :  { %1621 = vmatpush3.msra.mxu0 %v1883_v9  ;;  %v107_v26 = vsub.f32 %v1906_v17, %v106_v22  ;;  %v1969_v41 = vsub.f32 %v20_v33, %v1950_v36  ;;  %v1971_v42 = vand.u32 4294901760, %v18_v38  ;;  %v1974_v43 = vsub.f32 %v521_v34, %v1952_v37 }
   0xc   :  { %1636 = vmatprep.subr.mxu0 %v1837_v3  ;;  %1626 = vmatpush3.msra.mxu1 %v143_v25  ;;  %v164_v31 = vand.u32 4294901760, %v163_v28  ;;  %v1982_v44 = vsub.f32 %v19_v35, %v1960_v39  ;;  %v1984_v45 = vand.u32 4294901760, %v17_v40  ;;  %v2090_v0 = vand.u32 4294901760, %v28_v63  ;;  %p1822_p3 = por %p1821_p2, %p1820_p1 }
   0xd   :  { %v108_v29 = vand.u32 4294901760, %v107_v26  ;;  %1627 = vmatprep.subr.mxu1 %v1837_v3  ;;  %v1991_v46 = vsub.f32 %v18_v38, %v1971_v42  ;;  %v629_v47 = vand.u32 4294901760, %v1969_v41  ;;  %v594_v48 = vand.u32 4294901760, %v1974_v43 }
   0xe   :  { %1628 = vmatpush3.msra.mxu1 %v150_v27  ;;  %v2002_v49 = vsub.f32 %v17_v40, %v1984_v45  ;;  %v636_v50 = vand.u32 4294901760, %v1982_v44  ;;  %v2096_v2 = vsub.f32 %v28_v63, %v2090_v0  ;;  %p1823_p4 = pnand %p1822_p3, %p1816_p0 }
   0xf   :  { %1623 = vmatmul.mubr.f32.vlgmr.msra.gmra.mxu0 %v108_v29  ;;  %1629 = vmatprep.subr.mxu1 %v1837_v3  ;;  %v630_v51 = vsub.f32 %v1969_v41, %v629_v47  ;;  %v595_v52 = vsub.f32 %v1974_v43, %v594_v48  ;;  %v643_v53 = vand.u32 4294901760, %v1991_v46 }
  0x10   :  { %1637 = vmatpush3.msra.mxu0 %v140_v11  ;;  %1630 = vmatpush3.msra.mxu1 %v157_v30  ;;  %v637_v54 = vsub.f32 %v1982_v44, %v636_v50  ;;  %v650_v55 = vand.u32 4294901760, %v2002_v49 }
  0x11   :  { %1638 = vmatprep.subr.mxu0 %v1837_v3  ;;  %1631 = vmatprep.subr.mxu1 %v1837_v3  ;;  %v631_v56 = vand.u32 4294901760, %v630_v51  ;;  %v596_v57 = vand.u32 4294901760, %v595_v52  ;;  %v644_v58 = vsub.f32 %v1991_v46, %v643_v53 }
  0x12   :  { %1639 = vmatpush3.msra.mxu0 %v1895_v13  ;;  %1632 = vmatpush3.msra.mxu1 %v164_v31  ;;  %v638_v59 = vand.u32 4294901760, %v637_v54  ;;  %v651_v60 = vsub.f32 %v2002_v49, %v650_v55 }
  0x13   :  { %1640 = vmatprep.subr.mxu0 %v1837_v3  ;;  %1634 = vmatmul.mubr.f32.vlgmr.msra.gmra.mxu1 %v1892_v12  ;;  %v645_v61 = vand.u32 4294901760, %v644_v58 }
  0x14   :  { %1641 = vmatpush3.msra.mxu0 %v1898_v14  ;;  %1647 = vmatprep.subr.mxu1 %v1837_v3  ;;  %v652_v62 = vand.u32 4294901760, %v651_v60 }
  0x15   :  { %1642 = vmatprep.subr.mxu0 %v1837_v3  ;;  %1644 = vmatprep.mubr.msk.f32.mxu0 %vm1838_vm1, %v1837_v3 }
  0x16   :  { %1643 = vmatpush3.msra.mxu0 %v1902_v15  ;;  %1648 = vmatpush3.msra.mxu1 %v1870_v4 }
  0x17   :  { %1645 = vmatmul.mubr.f32.vlgmr.msra.gmra.mxu0 %v1906_v17  ;;  %1649 = vmatprep.subr.mxu1 %v1837_v3 }
  0x18   :  { %1658 = vmatprep.subr.mxu0 %v1837_v3  ;;  %1650 = vmatpush3.msra.mxu1 %v1872_v5 }
  0x19   :  { %1659 = vmatpush3.msra.mxu0 %v141_v16  ;;  %1651 = vmatprep.subr.mxu1 %v1837_v3 }
  0x1a   :  { %1660 = vmatprep.subr.mxu0 %v1837_v3  ;;  %1652 = vmatpush3.msra.mxu1 %v1874_v6 }
  0x1b   :  { %1661 = vmatpush3.msra.mxu0 %v148_v18  ;;  %1653 = vmatprep.subr.mxu1 %v1837_v3 }
  0x1c   :  { %1662 = vmatprep.subr.mxu0 %v1837_v3  ;;  %1654 = vmatpush3.msra.mxu1 %v1883_v9 }
  0x1d   :  { %1655 = vmatprep.mubr.msk.f32.mxu1 %vm1838_vm1, %v1837_v3  ;;  %1663 = vmatpush3.msra.mxu0 %v155_v19 }
  0x1e   :  { %1656 = vmatmul.mubr.f32.vlgmr.msra.gmra.mxu1 %v106_v22  ;;  %1664 = vmatprep.subr.mxu0 %v1837_v3 }
  0x1f   :  { %1669 = vmatprep.subr.mxu1 %v1837_v3  ;;  %1665 = vmatpush3.msra.mxu0 %v162_v20 }
  0x20   :  { %1666 = vmatprep.mubr.msk.f32.mxu0 %vm1838_vm1, %v1837_v3  ;;  %1670 = vmatpush3.msra.mxu1 %v1870_v4  ;;  %v2098_v4 = vand.u32 4294901760, %v27_v1 }
  0x21   :  { %1667 = vmatmul.mubr.f32.vlgmr.msra.gmra.mxu0 %v1892_v12  ;;  %1671 = vmatprep.subr.mxu1 %v1837_v3 }
  0x22   :  { %1680 = vmatprep.subr.mxu0 %v1837_v3  ;;  %1672 = vmatpush3.msra.mxu1 %v1872_v5  ;;  %v26_v5 = vld [vmem:[%s2202_s2 + $0x48] sm:$0xff]  ;;  %v2107_v7 = vsub.f32 %v27_v1, %v2098_v4 }
  0x23   :  { %1681 = vmatpush3.msra.mxu0 %v1950_v36  ;;  %1673 = vmatprep.subr.mxu1 %v1837_v3  ;;  %v2109_v8 = vand.u32 4294901760, %v26_v5 }
  0x24   :  { %1682 = vmatprep.subr.mxu0 %v1837_v3  ;;  %1674 = vmatpush3.msra.mxu1 %v1874_v6  ;;  %v1127_v6 = vand.u32 4294901760, %v2096_v2  ;;  %v1134_v11 = vand.u32 4294901760, %v2107_v7 }
  0x25   :  { %1683 = vmatpush3.msra.mxu0 %v1960_v39  ;;  %1675 = vmatprep.subr.mxu1 %v1837_v3 }
  0x26   :  { %1684 = vmatprep.subr.mxu0 %v1837_v3  ;;  %1676 = vmatpush3.msra.mxu1 %v1883_v9  ;;  %v25_v9 = vld [vmem:[%s2202_s2 + $0x40] sm:$0xff]  ;;  %v1128_v10 = vsub.f32 %v2096_v2, %v1127_v6  ;;  %v1135_v15 = vsub.f32 %v2107_v7, %v1134_v11 }
  0x27   :  { %1677 = vmatprep.mubr.msk.f32.mxu1 %vm1838_vm1, %v1837_v3  ;;  %1685 = vmatpush3.msra.mxu0 %v1971_v42  ;;  %v2123_v13 = vand.u32 4294901760, %v25_v9 }
  0x28   :  { %1678 = vmatmul.mubr.f32.vlgmr.msra.gmra.mxu1 %v1892_v12  ;;  %1686 = vmatprep.subr.mxu0 %v1837_v3  ;;  %v2121_v12 = vsub.f32 %v26_v5, %v2109_v8  ;;  %v1129_v14 = vand.u32 4294901760, %v1128_v10  ;;  %v1136_v18 = vand.u32 4294901760, %v1135_v15 }
  0x29   :  { %1691 = vmatprep.subr.mxu1 %v1837_v3  ;;  %1687 = vmatpush3.msra.mxu0 %v1984_v45  ;;  %v2132_v17 = vsub.f32 %v25_v9, %v2123_v13 }
  0x2a   :  { %1688 = vmatprep.mubr.msk.f32.mxu0 %vm1838_vm1, %v1837_v3  ;;  %1692 = vmatpush3.msra.mxu1 %v631_v56  ;;  %v1141_v16 = vand.u32 4294901760, %v2121_v12  ;;  %v1522_v56 = vld [vmem:[%s2202_s2 + $0x60] ss:$0 sm:$0xff] }
  0x2b   :  { %1689 = vmatmul.mubr.f32.vlgmr.msra.gmra.mxu0 %v596_v57  ;;  %1693 = vmatprep.subr.mxu1 %v1837_v3  ;;  %v1148_v20 = vand.u32 4294901760, %v2132_v17 }
  0x2c   :  { %1702 = vmatprep.subr.mxu0 %v1837_v3  ;;  %1694 = vmatpush3.msra.mxu1 %v638_v59  ;;  %v1142_v19 = vsub.f32 %v2121_v12, %v1141_v16 }
  0x2d   :  { %1703 = vmatpush3.msra.mxu0 %v1969_v41  ;;  %1695 = vmatprep.subr.mxu1 %v1837_v3  ;;  %v1149_v22 = vsub.f32 %v2132_v17, %v1148_v20 }
  0x2e   :  { %1704 = vmatprep.subr.mxu0 %v1837_v3  ;;  %1696 = vmatpush3.msra.mxu1 %v645_v61  ;;  %v1143_v21 = vand.u32 4294901760, %v1142_v19 }
  0x2f   :  { %1705 = vmatpush3.msra.mxu0 %v1982_v44  ;;  %1697 = vmatprep.subr.mxu1 %v1837_v3  ;;  %v1150_v23 = vand.u32 4294901760, %v1149_v22 }
  0x30   :  { %1706 = vmatprep.subr.mxu0 %v1837_v3  ;;  %1698 = vmatpush3.msra.mxu1 %v652_v62 }
  0x31   :  { %1699 = vmatprep.mubr.msk.f32.mxu1 %vm1838_vm1, %v1837_v3  ;;  %1707 = vmatpush3.msra.mxu0 %v1991_v46 }
  0x32   :  { %1700 = vmatmul.mubr.f32.vlgmr.msra.gmra.mxu1 %v1952_v37  ;;  %1708 = vmatprep.subr.mxu0 %v1837_v3 }
  0x33   :  { %1713 = vmatprep.subr.mxu1 %v1837_v3  ;;  %1709 = vmatpush3.msra.mxu0 %v2002_v49 }
  0x34   :  { %1710 = vmatprep.mubr.msk.f32.mxu0 %vm1838_vm1, %v1837_v3  ;;  %1714 = vmatpush3.msra.mxu1 %v1950_v36 }
  0x35   :  { %1711 = vmatmul.mubr.f32.vlgmr.msra.gmra.mxu0 %v1974_v43  ;;  %1715 = vmatprep.subr.mxu1 %v1837_v3 }
  0x36   :  { %1724 = vmatprep.subr.mxu0 %v1837_v3  ;;  %1716 = vmatpush3.msra.mxu1 %v1960_v39 }
  0x37   :  { %1725 = vmatpush3.msra.mxu0 %v629_v47  ;;  %1717 = vmatprep.subr.mxu1 %v1837_v3 }
  0x38   :  { %1726 = vmatprep.subr.mxu0 %v1837_v3  ;;  %1718 = vmatpush3.msra.mxu1 %v1971_v42 }
  0x39   :  { %1727 = vmatpush3.msra.mxu0 %v636_v50  ;;  %1719 = vmatprep.subr.mxu1 %v1837_v3 }
  0x3a   :  { %1728 = vmatprep.subr.mxu0 %v1837_v3  ;;  %1720 = vmatpush3.msra.mxu1 %v1984_v45 }
  0x3b   :  { %1721 = vmatprep.mubr.msk.f32.mxu1 %vm1838_vm1, %v1837_v3  ;;  %1729 = vmatpush3.msra.mxu0 %v643_v53 }
  0x3c   :  { %1722 = vmatmul.mubr.f32.vlgmr.msra.gmra.mxu1 %v594_v48  ;;  %1730 = vmatprep.subr.mxu0 %v1837_v3 }
  0x3d   :  { %1735 = vmatprep.subr.mxu1 %v1837_v3  ;;  %1731 = vmatpush3.msra.mxu0 %v650_v55 }
  0x3e   :  { %1732 = vmatprep.mubr.msk.f32.mxu0 %vm1838_vm1, %v1837_v3  ;;  %1736 = vmatpush3.msra.mxu1 %v1950_v36 }
  0x3f   :  { %1733 = vmatmul.mubr.f32.vlgmr.msra.gmra.mxu0 %v1952_v37  ;;  %1737 = vmatprep.subr.mxu1 %v1837_v3 }
  0x40   :  { %1743 = vmatprep.mubr.msk.f32.mxu1 %vm1838_vm1, %v1837_v3  ;;  %1738 = vmatpush3.msra.mxu1 %v1960_v39 }
  0x41   :  { %1746 = vmatprep.subr.mxu0 %v1837_v3  ;;  %1739 = vmatprep.subr.mxu1 %v1837_v3 }
  0x42   :  { %1754 = vmatprep.mubr.msk.f32.mxu0 %vm1838_vm1, %v1837_v3  ;;  %1740 = vmatpush3.msra.mxu1 %v1971_v42 }
  0x43   :  { %1741 = vmatprep.subr.mxu1 %v1837_v3  ;;  %1747 = vmatpush3.msra.mxu0 %v2090_v0 }
  0x44   :  { %1742 = vmatpush3.msra.mxu1 %v1984_v45  ;;  %1748 = vmatprep.subr.mxu0 %v1837_v3 }
  0x45   :  { %1744 = vmatmul.mubr.f32.vlgmr.msra.gmra.mxu1 %v1952_v37  ;;  %1757 = vmatprep.subr.mxu1 %v1837_v3 }
  0x46   :  { %1765 = vmatprep.mubr.msk.f32.mxu1 %vm1838_vm1, %v1837_v3  ;;  %1749 = vmatpush3.msra.mxu0 %v2098_v4 }
  0x47   :  { %1750 = vmatprep.subr.mxu0 %v1837_v3  ;;  %1758 = vmatpush3.msra.mxu1 %v1129_v14 }
  0x48   :  { %1751 = vmatpush3.msra.mxu0 %v2109_v8  ;;  %1759 = vmatprep.subr.mxu1 %v1837_v3 }
  0x49   :  { %1752 = vmatprep.subr.mxu0 %v1837_v3  ;;  %1760 = vmatpush3.msra.mxu1 %v1136_v18 }
  0x4a   :  { %1753 = vmatpush3.msra.mxu0 %v2123_v13  ;;  %1761 = vmatprep.subr.mxu1 %v1837_v3 }
  0x4b   :  { %1768 = vmatprep.subr.mxu0 %v1837_v3  ;;  %1762 = vmatpush3.msra.mxu1 %v1143_v21 }
  0x4c   :  { %1763 = vmatprep.subr.mxu1 %v1837_v3 }
  0x4d   :  { %1764 = vmatpush3.msra.mxu1 %v1150_v23 }
  0x4e   :  { %1779 = vmatprep.subr.mxu1 %v1837_v3 }
  0xcf   :  { %v110_v24 = vpop.f32.mrf.mxu0 }
  0xd1   :  { %v1624_v25 = vpop.f32.mrf.mxu0 }
  0xd3   :  { %v201_v26 = vpop.f32.mrf.mxu1 }
  0xd4   :  { %v202_v35 = vadd.f32 %v201_v26, %v110_v24 }
  0xd5   :  { %v1635_v27 = vpop.f32.mrf.mxu1 }
  0xd7   :  { %v281_v28 = vpop.f32.mrf.mxu0 }
  0xd8   :  { %v282_v38 = vadd.f32 %v281_v28, %v202_v35 }
  0xd9   :  { %v1646_v29 = vpop.f32.mrf.mxu0 }
  0xde   :  { %v358_v30 = vpop.f32.mrf.mxu1 }
  0xdf   :  { %v359_v40 = vadd.f32 %v358_v30, %v282_v38 }
  0xe0   :  { %v1657_v31 = vpop.f32.mrf.mxu1 }
  0xe1   :  { %v441_v32 = vpop.f32.mrf.mxu0 }
  0xe2   :  { %v442_v42 = vadd.f32 %v441_v32, %v359_v40 }
  0xe3   :  { %v1668_v33 = vpop.f32.mrf.mxu0 }
  0xe8   :  { %v516_v34 = vpop.f32.mrf.mxu1 }
  0xe9   :  { %v517_v44 = vadd.f32 %v516_v34, %v442_v42 }
  0xea   :  { %v1679_v36 = vpop.f32.mrf.mxu1 }
  0xeb   :  { %v598_v37 = vpop.f32.mrf.mxu0 }
  0xec   :  { %v599_v47 = vadd.f32 %v598_v37, %v517_v44 }
  0xed   :  { %v1690_v39 = vpop.f32.mrf.mxu0 }
  0xf2   :  { %v689_v41 = vpop.f32.mrf.mxu1 }
  0xf3   :  { %v690_v48 = vadd.f32 %v689_v41, %v599_v47 }
  0xf4   :  { %v1701_v43 = vpop.f32.mrf.mxu1 }
  0xf5   :  { %v769_v45 = vpop.f32.mrf.mxu0 }
  0xf6   :  { %v770_v51 = vadd.f32 %v769_v45, %v690_v48 }
  0xf7   :  { %v1712_v46 = vpop.f32.mrf.mxu0 }
  0xfc   :  { %v846_v49 = vpop.f32.mrf.mxu1 }
  0xfd   :  { %v847_v53 = vadd.f32 %v846_v49, %v770_v51 }
  0xfe   :  { %v1723_v50 = vpop.f32.mrf.mxu1 }
  0xff   :  { %v929_v52 = vpop.f32.mrf.mxu0 }
 0x100   :  { %v930_v55 = vadd.f32 %v929_v52, %v847_v53 }
 0x101   :  { %v1734_v54 = vpop.f32.mrf.mxu0 }
 0x105   :  { %v1004_v57 = vpop.f32.mrf.mxu1 }
 0x106   :  { %v1005_v58 = vadd.f32 %v1004_v57, %v930_v55 }
 0x107   :  { %v1745_v59 = vpop.f32.mrf.mxu1 }
 0x108   :  { %v1012_v60 = vadd.f32 %v1522_v56, %v1005_v58 }
 0x10a   :  { %v1013_v61 = vmax.f32 %v1012_v60, 0.0 }
 0x10c   :  { %v1019_v62 = vsel %vm31_vm0, %v1013_v61, 0 }
 0x10d   :  { %v1090_v63 = vand.u32 4294901760, %v1019_v62 }
 0x10f   :  { %v1091_v1 = vsub.f32 %v1019_v62, %v1090_v63  ;;  %1766 = vmatmul.mubr.f32.vlgmr.msra.gmra.mxu1 %v1090_v63 }
 0x110   :  { %1780 = vmatpush3.msra.mxu1 %v2090_v0  ;;  %1787 = vmatprep.mubr.msk.f32.mxu1 %vm1838_vm1, %v1837_v3 }
 0x111   :  { %1781 = vmatprep.subr.mxu1 %v1837_v3  ;;  %v1092_v5 = vand.u32 4294901760, %v1091_v1 }
 0x112   :  { %1782 = vmatpush3.msra.mxu1 %v2098_v4 }
 0x113   :  { %1783 = vmatprep.subr.mxu1 %v1837_v3  ;;  %v1093_v9 = vsub.f32 %v1091_v1, %v1092_v5 }
 0x114   :  { %1784 = vmatpush3.msra.mxu1 %v2109_v8 }
 0x115   :  { %1785 = vmatprep.subr.mxu1 %v1837_v3  ;;  %v1094_v10 = vand.u32 4294901760, %v1093_v9 }
 0x116   :  { %1786 = vmatpush3.msra.mxu1 %v2123_v13 }
 0x117   :  { %1788 = vmatmul.mubr.f32.vlgmr.msra.gmra.mxu1 %v1092_v5  ;;  %1801 = vmatprep.subr.mxu1 %v1837_v3 }
 0x118   :  { %1755 = vmatmul.mubr.f32.vlgmr.msra.gmra.mxu0 %v1094_v10  ;;  %1802 = vmatpush3.msra.mxu1 %v2090_v0 }
 0x119   :  { %1769 = vmatpush3.msra.mxu0 %v2096_v2  ;;  %1803 = vmatprep.subr.mxu1 %v1837_v3 }
 0x11a   :  { %1770 = vmatprep.subr.mxu0 %v1837_v3  ;;  %1804 = vmatpush3.msra.mxu1 %v2098_v4 }
 0x11b   :  { %1771 = vmatpush3.msra.mxu0 %v2107_v7  ;;  %1805 = vmatprep.subr.mxu1 %v1837_v3  ;;  %v1523_v7 = vld [vmem:[%s2202_s2 + $0x68] ss:$0 sm:$0xff] }
 0x11c   :  { %1772 = vmatprep.subr.mxu0 %v1837_v3  ;;  %1806 = vmatpush3.msra.mxu1 %v2109_v8 }
 0x11d   :  { %1773 = vmatpush3.msra.mxu0 %v2121_v12  ;;  %1807 = vmatprep.subr.mxu1 %v1837_v3 }
 0x11e   :  { %1774 = vmatprep.subr.mxu0 %v1837_v3  ;;  %1776 = vmatprep.mubr.msk.f32.mxu0 %vm1838_vm1, %v1837_v3 }
 0x11f   :  { %1775 = vmatpush3.msra.mxu0 %v2132_v17  ;;  %1808 = vmatpush3.msra.mxu1 %v2123_v13 }
 0x120   :  { %1809 = vmatprep.mubr.msk.f32.mxu1 %vm1838_vm1, %v1837_v3  ;;  %1777 = vmatmul.mubr.f32.vlgmr.msra.gmra.mxu0 %v1091_v1 }
 0x121   :  { %1790 = vmatprep.subr.mxu0 %v1837_v3  ;;  %1810 = vmatmul.mubr.f32.vlgmr.msra.gmra.mxu1 %v1090_v63 }
 0x122   :  { %1791 = vmatpush3.msra.mxu0 %v1127_v6  ;;  %1798 = vmatprep.mubr.msk.f32.mxu0 %vm1838_vm1, %v1837_v3 }
 0x123   :  { %1792 = vmatprep.subr.mxu0 %v1837_v3 }
 0x124   :  { %1793 = vmatpush3.msra.mxu0 %v1134_v11 }
 0x125   :  { %1794 = vmatprep.subr.mxu0 %v1837_v3 }
 0x126   :  { %1795 = vmatpush3.msra.mxu0 %v1141_v16 }
 0x127   :  { %1796 = vmatprep.subr.mxu0 %v1837_v3 }
 0x128   :  { %1797 = vmatpush3.msra.mxu0 %v1148_v20 }
 0x129   :  { %1799 = vmatmul.mubr.f32.vlgmr.msra.gmra.mxu0 %v1090_v63 }
 0x1cf   :  { %v1187_v0 = vpop.f32.mrf.mxu1 }
 0x1d1   :  { %v1767_v2 = vpop.f32.mrf.mxu1 }
 0x1d7   :  { %v1344_v4 = vpop.f32.mrf.mxu1 }
 0x1d8   :  { %v1096_v6 = vpop.f32.mrf.mxu0 }
 0x1d9   :  { %v1789_v8 = vpop.f32.mrf.mxu1  ;;  %v1097_v11 = vadd.f32 %v1523_v7, %v1096_v6 }
 0x1da   :  { %v1756_v13 = vpop.f32.mrf.mxu0 }
 0x1db   :  { %v1188_v15 = vadd.f32 %v1187_v0, %v1097_v11 }
 0x1e0   :  { %v1267_v14 = vpop.f32.mrf.mxu0 }
 0x1e1   :  { %v1502_v12 = vpop.f32.mrf.mxu1  ;;  %v1268_v18 = vadd.f32 %v1267_v14, %v1188_v15 }
 0x1e2   :  { %v1778_v16 = vpop.f32.mrf.mxu0 }
 0x1e3   :  { %v1811_v3 = vpop.f32.mrf.mxu1  ;;  %v1345_v17 = vadd.f32 %v1344_v4, %v1268_v18 }
 0x1e9   :  { %v1427_v19 = vpop.f32.mrf.mxu0 }
 0x1ea   :  { %v1428_v20 = vadd.f32 %v1427_v19, %v1345_v17 }
 0x1eb   :  { %v1800_v21 = vpop.f32.mrf.mxu0 }
 0x1ec   :  { %v1503_v22 = vadd.f32 %v1502_v12, %v1428_v20 }
 0x1ee   :  { %v1506_v23 = vmax.f32 %v1503_v22, 0.0 }
 0x1f0   :  { %1507 = vst.msk [vmem:[#allocation2] sm:$0xff] %vm31_vm0, %v1506_v23 }
 0x1f1   :  { %1826 = shalt.err (!%p1823_p4)
}
 0x1f2   :  { %1517 = dma.vmem_to_hbm [thread:$0]  %s1515_s16, 128, %s2203_s3, [#allocation3]  }
 0x1f3   :  { %1835 = dma.done.wait [#allocation3], 128  }
 0x1f4   :  { %1836 = vsyncadd [#allocation3], 4294967168 }
 0x1f5   :  { %1521 = vsyncpa [#allocation3], 1 }

</bundles_post_ra>
